<compile_context>
chip_gen: v7x
topology: tpu7x:2x2x1
jax: 0.10.0
libtpu: 0.0.40
codegen_flags: <defaults>
</compile_context>

<pallas_src>
import functools

import jax
import jax.numpy as jnp
from jax.experimental import pallas as pl
from jax.experimental.pallas import tpu as pltpu

INPUT_SIZE = 784
H1 = 300
H2 = 100
NUM_CLASSES = 10

# Lane-dense (128-multiple) padded dims.
IN_P = 896     # 784 -> 896
H1_P = 384     # 300 -> 384
H2_P = 128     # 100 -> 128
OUT_P = 128    # 10  -> 128


def _round_up(x, m):
    return (x + m - 1) // m * m


def _sigmoid(z):
    # exp and the approx reciprocal both lower to the EUP slot; keeps VALU free.
    return pl.reciprocal(1.0 + jnp.exp(-z), approx=True)


def mlp_kernel(x_ref, w1_ref, b1_ref, w2_ref, b2_ref, w3_ref, b3_ref, o_ref):
    # x_ref: (TILE_B, IN_P) bf16; weights bf16 [in, out]; biases f32 (1, out).
    x = x_ref[...]

    h1 = jnp.dot(x, w1_ref[...], preferred_element_type=jnp.float32) + b1_ref[...]
    h1 = _sigmoid(h1)                                   # f32

    h2 = jnp.dot(h1.astype(jnp.bfloat16), w2_ref[...],
                 preferred_element_type=jnp.float32) + b2_ref[...]
    h2 = _sigmoid(h2)

    h3 = jnp.dot(h2.astype(jnp.bfloat16), w3_ref[...],
                 preferred_element_type=jnp.float32) + b3_ref[...]
    o_ref[...] = _sigmoid(h3).astype(o_ref.dtype)


def init_params(key):
    """Deterministic init mirroring nn.Linear's U(-1/sqrt(fan_in), 1/sqrt(fan_in)).

    Returns unpadded f32 params with weights stored as [in, out] (i.e. already
    transposed relative to PyTorch's [out, in]), biases 1-D [out].
    """
    ks = jax.random.split(key, 6)

    def linear(kw, kb, fan_in, fan_out):
        bound = 1.0 / jnp.sqrt(jnp.float32(fan_in))
        w = jax.random.uniform(kw, (fan_in, fan_out), jnp.float32, -bound, bound)
        b = jax.random.uniform(kb, (fan_out,), jnp.float32, -bound, bound)
        return w, b

    w1, b1 = linear(ks[0], ks[1], INPUT_SIZE, H1)
    w2, b2 = linear(ks[2], ks[3], H1, H2)
    w3, b3 = linear(ks[4], ks[5], H2, NUM_CLASSES)
    return (w1, b1, w2, b2, w3, b3)


def pack_params(params):
    """Zero-pad to lane-dense shapes and cast weights to bf16 (biases stay f32).

    Zero padding along each weight's *input* dim guarantees that the sigmoid(0)=0.5
    values produced in padded hidden lanes contribute nothing downstream.
    """
    w1, b1, w2, b2, w3, b3 = params

    def pad_w(w, in_p, out_p):
        wp = jnp.zeros((in_p, out_p), jnp.float32)
        wp = wp.at[: w.shape[0], : w.shape[1]].set(w)
        return wp.astype(jnp.bfloat16)

    def pad_b(b, out_p):
        bp = jnp.zeros((1, out_p), jnp.float32)
        return bp.at[0, : b.shape[0]].set(b)

    return (
        pad_w(w1, IN_P, H1_P), pad_b(b1, H1_P),
        pad_w(w2, H1_P, H2_P), pad_b(b2, H2_P),
        pad_w(w3, H2_P, OUT_P), pad_b(b3, OUT_P),
    )


@functools.partial(jax.jit, static_argnames=("tile_b",))
def mlp_forward(x, packed_params, tile_b=None):
    """x: (batch, 784) f32. Returns (batch, 10) f32."""
    w1, b1, w2, b2, w3, b3 = packed_params
    batch, feat = x.shape
    assert feat == INPUT_SIZE

    if tile_b is None:
        tile_b = min(256, _round_up(batch, 8))
    padded_batch = _round_up(batch, tile_b)
    grid = (padded_batch // tile_b,)

    # Zero-pad batch + features; cast activations to bf16 for the MXU.
    xp = jnp.zeros((padded_batch, IN_P), jnp.bfloat16)
    xp = xp.at[:batch, :feat].set(x.astype(jnp.bfloat16))

    resident = lambda arr: pl.BlockSpec(arr.shape, lambda i: (0, 0))

    flops = 2 * padded_batch * (IN_P * H1_P + H1_P * H2_P + H2_P * OUT_P)
    transcendentals = 2 * padded_batch * (H1_P + H2_P + OUT_P)   # exp + rcp
    weight_bytes = sum(int(a.size) * a.dtype.itemsize
                       for a in (w1, b1, w2, b2, w3, b3))
    bytes_accessed = weight_bytes + padded_batch * (IN_P * 2 + OUT_P * 4)

    out = pl.pallas_call(
        mlp_kernel,
        out_shape=jax.ShapeDtypeStruct((padded_batch, OUT_P), jnp.float32),
        grid=grid,
        in_specs=[
            pl.BlockSpec((tile_b, IN_P), lambda i: (i, 0)),
            resident(w1), resident(b1),
            resident(w2), resident(b2),
            resident(w3), resident(b3),
        ],
        out_specs=pl.BlockSpec((tile_b, OUT_P), lambda i: (i, 0)),
        compiler_params=pltpu.CompilerParams(
            dimension_semantics=("parallel",),   # v7x: shard batch tiles across both TCs
            vmem_limit_bytes=16 << 20,           # tiny footprint; leave headroom on v7x
        ),
        cost_estimate=pl.CostEstimate(
            flops=flops,
            transcendentals=transcendentals,
            bytes_accessed=bytes_accessed,
        ),
    )(xp, w1, b1, w2, b2, w3, b3)

    # Strip batch padding and the 118 padded output lanes.
    return out[:batch, :NUM_CLASSES]


def reference_forward(x, params):
    w1, b1, w2, b2, w3, b3 = params
    h = jax.nn.sigmoid(x @ w1 + b1)
    h = jax.nn.sigmoid(h @ w2 + b2)
    return jax.nn.sigmoid(h @ w3 + b3)


if __name__ == "__main__":
    key = jax.random.PRNGKey(0)
    k_param, k_x = jax.random.split(key)

    params = init_params(k_param)
    packed = pack_params(params)

    # Small primary check (single grid step).
    batch = 8
    x = jax.random.normal(k_x, (batch, INPUT_SIZE), jnp.float32)
    out = jax.block_until_ready(mlp_forward(x, packed))
    ref = reference_forward(x, params)
    assert out.shape == (batch, NUM_CLASSES)
    # bf16 weights/activations at the dot inputs -> relaxed tolerance vs f32 reference.
    assert jnp.allclose(out, ref, atol=2e-2, rtol=2e-2), float(
        jnp.max(jnp.abs(out - ref)))

    # Non-multiple batch with a forced small tile to exercise grid > 1 + padding/slicing.
    batch2 = 37
    x2 = jax.random.normal(jax.random.PRNGKey(1), (batch2, INPUT_SIZE), jnp.float32)
    out2 = jax.block_until_ready(mlp_forward(x2, packed, tile_b=8))
    ref2 = reference_forward(x2, params)
    assert out2.shape == (batch2, NUM_CLASSES)
    assert jnp.allclose(out2, ref2, atol=2e-2, rtol=2e-2), float(
        jnp.max(jnp.abs(out2 - ref2)))

    print("KERNEL_OK")
</pallas_src>

<mosaic_0001>
module attributes {stable_mosaic.version = 11 : i64} {
  func.func @mlp_kernel(%arg0: i32, %arg1: memref<8x896xbf16, #tpu.memory_space<vmem>>, %arg2: memref<896x384xbf16, #tpu.memory_space<vmem>>, %arg3: memref<1x384xf32, #tpu.memory_space<vmem>>, %arg4: memref<384x128xbf16, #tpu.memory_space<vmem>>, %arg5: memref<1x128xf32, #tpu.memory_space<vmem>>, %arg6: memref<128x128xbf16, #tpu.memory_space<vmem>>, %arg7: memref<1x128xf32, #tpu.memory_space<vmem>>, %arg8: memref<8x128xf32, #tpu.memory_space<vmem>>) attributes {dimension_semantics = [#tpu.dimension_semantics<parallel>], iteration_bounds = array<i64: 1>, scalar_prefetch = 0 : i64, scratch_operands = 0 : i64, tpu.core_type = #tpu.core_type<tc>, window_params = [{transform_indices = @transform_0, window_bounds = array<i64: 8, 896>}, {pipeline_mode = #tpu.pipeline_mode<synchronous>, transform_indices = @transform_1, window_bounds = array<i64: 896, 384>}, {pipeline_mode = #tpu.pipeline_mode<synchronous>, transform_indices = @transform_2, window_bounds = array<i64: 1, 384>}, {pipeline_mode = #tpu.pipeline_mode<synchronous>, transform_indices = @transform_3, window_bounds = array<i64: 384, 128>}, {pipeline_mode = #tpu.pipeline_mode<synchronous>, transform_indices = @transform_4, window_bounds = array<i64: 1, 128>}, {pipeline_mode = #tpu.pipeline_mode<synchronous>, transform_indices = @transform_5, window_bounds = array<i64: 128, 128>}, {pipeline_mode = #tpu.pipeline_mode<synchronous>, transform_indices = @transform_6, window_bounds = array<i64: 1, 128>}, {transform_indices = @transform_7, window_bounds = array<i64: 8, 128>}]} {
    %c0 = arith.constant 0 : index
    %c0_0 = arith.constant 0 : index
    %0 = vector.load %arg1[%c0, %c0_0] : memref<8x896xbf16, #tpu.memory_space<vmem>>, vector<8x896xbf16>
    %c0_1 = arith.constant 0 : index
    %c0_2 = arith.constant 0 : index
    %1 = vector.load %arg2[%c0_1, %c0_2] : memref<896x384xbf16, #tpu.memory_space<vmem>>, vector<896x384xbf16>
    %cst = arith.constant dense<0.000000e+00> : vector<8x384xf32>
    %2 = tpu.matmul %0, %1, %cst {dimension_numbers = #tpu.dot_dimension_numbers<[1], [0], [0], [1], [0, 0, 1, 1], [], []>} : vector<8x896xbf16>, vector<896x384xbf16>, vector<8x384xf32> -> vector<8x384xf32>
    %c0_3 = arith.constant 0 : index
    %c0_4 = arith.constant 0 : index
    %3 = vector.load %arg3[%c0_3, %c0_4] : memref<1x384xf32, #tpu.memory_space<vmem>>, vector<1x384xf32>
    %4 = vector.broadcast %3 : vector<1x384xf32> to vector<8x384xf32>
    %5 = arith.addf %2, %4 : vector<8x384xf32>
    %cst_5 = arith.constant 0.000000e+00 : f32
    %6 = vector.broadcast %cst_5 : f32 to vector<8x384xf32>
    %7 = arith.subf %6, %5 : vector<8x384xf32>
    %8 = math.exp %7 : vector<8x384xf32>
    %cst_6 = arith.constant 1.000000e+00 : f32
    %9 = vector.broadcast %cst_6 : f32 to vector<8x384xf32>
    %10 = arith.addf %9, %8 : vector<8x384xf32>
    %11 = tpu.reciprocal %10 {approx = true} : vector<8x384xf32> -> vector<8x384xf32>
    %12 = arith.truncf %11 : vector<8x384xf32> to vector<8x384xbf16>
    %c0_7 = arith.constant 0 : index
    %c0_8 = arith.constant 0 : index
    %13 = vector.load %arg4[%c0_7, %c0_8] : memref<384x128xbf16, #tpu.memory_space<vmem>>, vector<384x128xbf16>
    %cst_9 = arith.constant dense<0.000000e+00> : vector<8x128xf32>
    %14 = tpu.matmul %12, %13, %cst_9 {dimension_numbers = #tpu.dot_dimension_numbers<[1], [0], [0], [1], [0, 0, 1, 1], [], []>} : vector<8x384xbf16>, vector<384x128xbf16>, vector<8x128xf32> -> vector<8x128xf32>
    %c0_10 = arith.constant 0 : index
    %c0_11 = arith.constant 0 : index
    %15 = vector.load %arg5[%c0_10, %c0_11] : memref<1x128xf32, #tpu.memory_space<vmem>>, vector<1x128xf32>
    %16 = vector.broadcast %15 : vector<1x128xf32> to vector<8x128xf32>
    %17 = arith.addf %14, %16 : vector<8x128xf32>
    %cst_12 = arith.constant 0.000000e+00 : f32
    %18 = vector.broadcast %cst_12 : f32 to vector<8x128xf32>
    %19 = arith.subf %18, %17 : vector<8x128xf32>
    %20 = math.exp %19 : vector<8x128xf32>
    %cst_13 = arith.constant 1.000000e+00 : f32
    %21 = vector.broadcast %cst_13 : f32 to vector<8x128xf32>
    %22 = arith.addf %21, %20 : vector<8x128xf32>
    %23 = tpu.reciprocal %22 {approx = true} : vector<8x128xf32> -> vector<8x128xf32>
    %24 = arith.truncf %23 : vector<8x128xf32> to vector<8x128xbf16>
    %c0_14 = arith.constant 0 : index
    %c0_15 = arith.constant 0 : index
    %25 = vector.load %arg6[%c0_14, %c0_15] : memref<128x128xbf16, #tpu.memory_space<vmem>>, vector<128x128xbf16>
    %cst_16 = arith.constant dense<0.000000e+00> : vector<8x128xf32>
    %26 = tpu.matmul %24, %25, %cst_16 {dimension_numbers = #tpu.dot_dimension_numbers<[1], [0], [0], [1], [0, 0, 1, 1], [], []>} : vector<8x128xbf16>, vector<128x128xbf16>, vector<8x128xf32> -> vector<8x128xf32>
    %c0_17 = arith.constant 0 : index
    %c0_18 = arith.constant 0 : index
    %27 = vector.load %arg7[%c0_17, %c0_18] : memref<1x128xf32, #tpu.memory_space<vmem>>, vector<1x128xf32>
    %28 = vector.broadcast %27 : vector<1x128xf32> to vector<8x128xf32>
    %29 = arith.addf %26, %28 : vector<8x128xf32>
    %cst_19 = arith.constant 0.000000e+00 : f32
    %30 = vector.broadcast %cst_19 : f32 to vector<8x128xf32>
    %31 = arith.subf %30, %29 : vector<8x128xf32>
    %32 = math.exp %31 : vector<8x128xf32>
    %cst_20 = arith.constant 1.000000e+00 : f32
    %33 = vector.broadcast %cst_20 : f32 to vector<8x128xf32>
    %34 = arith.addf %33, %32 : vector<8x128xf32>
    %35 = tpu.reciprocal %34 {approx = true} : vector<8x128xf32> -> vector<8x128xf32>
    %c0_21 = arith.constant 0 : index
    %c0_22 = arith.constant 0 : index
    %36 = vector.load %arg8[%c0_21, %c0_22] : memref<8x128xf32, #tpu.memory_space<vmem>>, vector<8x128xf32>
    tpu.vector_store %arg8[%c0_21, %c0_22], %35 {strides = array<i32>} : memref<8x128xf32, #tpu.memory_space<vmem>>, vector<8x128xf32>,
    return
  }
  func.func @transform_0(%arg0: i32) -> (i32, i32) {
    %c0_i32 = arith.constant 0 : i32
    %c0_i32_0 = arith.constant 0 : i32
    return %arg0, %c0_i32 : i32, i32
  }
  func.func @transform_1(%arg0: i32) -> (i32, i32) {
    %c0_i32 = arith.constant 0 : i32
    %c0_i32_0 = arith.constant 0 : i32
    %c0_i32_1 = arith.constant 0 : i32
    return %c0_i32, %c0_i32_0 : i32, i32
  }
  func.func @transform_2(%arg0: i32) -> (i32, i32) {
    %c0_i32 = arith.constant 0 : i32
    %c0_i32_0 = arith.constant 0 : i32
    %c0_i32_1 = arith.constant 0 : i32
    return %c0_i32, %c0_i32_0 : i32, i32
  }
  func.func @transform_3(%arg0: i32) -> (i32, i32) {
    %c0_i32 = arith.constant 0 : i32
    %c0_i32_0 = arith.constant 0 : i32
    %c0_i32_1 = arith.constant 0 : i32
    return %c0_i32, %c0_i32_0 : i32, i32
  }
  func.func @transform_4(%arg0: i32) -> (i32, i32) {
    %c0_i32 = arith.constant 0 : i32
    %c0_i32_0 = arith.constant 0 : i32
    %c0_i32_1 = arith.constant 0 : i32
    return %c0_i32, %c0_i32_0 : i32, i32
  }
  func.func @transform_5(%arg0: i32) -> (i32, i32) {
    %c0_i32 = arith.constant 0 : i32
    %c0_i32_0 = arith.constant 0 : i32
    %c0_i32_1 = arith.constant 0 : i32
    return %c0_i32, %c0_i32_0 : i32, i32
  }
  func.func @transform_6(%arg0: i32) -> (i32, i32) {
    %c0_i32 = arith.constant 0 : i32
    %c0_i32_0 = arith.constant 0 : i32
    %c0_i32_1 = arith.constant 0 : i32
    return %c0_i32, %c0_i32_0 : i32, i32
  }
  func.func @transform_7(%arg0: i32) -> (i32, i32) {
    %c0_i32 = arith.constant 0 : i32
    %c0_i32_0 = arith.constant 0 : i32
    return %arg0, %c0_i32 : i32, i32
  }
}

</mosaic_0001>

<bundles_post_ra>
// kernel: mlp_forward.1
= control target key start
LH: loop header
LB: loop body
LE: loop exit
PB: predicated region body
PF: predicated region fallthrough
CT: control target
= control target key end

     0   :  { %12 = vsyncpa [#allocation3], 0  ;;  %s2922_s0 = inlined_call_operand.vmem [shape: bf16[8,896], index: 0, kind: input, shape index: {}]   ;;  %s2923_s1 = inlined_call_operand.hbm [shape: bf16[896,384], index: 1, kind: input, shape index: {}]   ;;  %s2924_s2 = inlined_call_operand.vmem [shape: f32[1,384], index: 2, kind: input, shape index: {}]   ;;  %s2925_s3 = inlined_call_operand.hbm [shape: bf16[384,128], index: 3, kind: input, shape index: {}]   ;;  %s2926_s4 = inlined_call_operand.vmem [shape: f32[1,128], index: 4, kind: input, shape index: {}]   ;;  %s2927_s5 = inlined_call_operand.vmem [shape: bf16[128,128], index: 5, kind: input, shape index: {}]   ;;  %s2928_s6 = inlined_call_operand.vmem [shape: f32[1,128], index: 6, kind: input, shape index: {}]   ;;  %s2929_s7 = inlined_call_operand.hbm [shape: f32[8,128], index: 7, kind: output, shape index: {}]  }
   0x1   :  { %13 = vsyncpa [#allocation6], 0 }
   0x2   :  { %14 = vsyncpa [#allocation4], 0  ;;  %s2745_s24 = smov [#allocation2]   ;;  %s2673_s28 = scalar_lea.hbm %s2923_s1, 21504 }
   0x3   :  { %s22_s25 = sshll.u32 %s2745_s24, 4  ;;  %p2674_p0 = scmp.ne.s32.totalorder %s2923_s1, %s2673_s28  ;;  %s23_s25 = int_to_ptr.vmem [resolvable:$true] %s22_s25 }
   0x4   :  { %p2677_p1 = scmp.lt.u32.totalorder %s2673_s28, %s2923_s1 }
   0x6   :  { %p2679_p2 = pnand %p2677_p1, %p2674_p0 }
   0x8   :  { %2682 = shalt.err (!%p2679_p2)
}
   0x9   :  { %s2683_s10 = scalar_lea.vmem %s23_s25, 21504  ;;  %p2688_p4 = scmp.lt.s32.totalorder %s23_s25, %s23_s25 }
   0xa   :  { %p2684_p3 = scmp.ne.s32.totalorder %s23_s25, %s2683_s10  ;;  %p2689_p5 = scmp.lt.s32.totalorder %s2683_s10, %s2683_s10 }
   0xc   :  { %p2690_p6 = por %p2689_p5, %p2688_p4 }
   0xe   :  { %p2691_p7 = pnand %p2690_p6, %p2684_p3 }
  0x10   :  { %2694 = shalt.err (!%p2691_p7)
}
  0x11   :  { %s2746_s11 = smov 192   ;;  %s2747_s12 = smov 12  }
  0x12   :  { %28 = dma.hbm_to_vmem [thread:$0]  %s2923_s1, 21504, %s23_s25, [#allocation3], %s2746_s11, %s2746_s11, %s2747_s12  }
  0x13   :  { %s2748_s15 = smov [#allocation5]   ;;  %s2695_s19 = scalar_lea.hbm %s2925_s3, 3072 }
  0x14   :  { %s36_s16 = sshll.u32 %s2748_s15, 4  ;;  %p2696_p8 = scmp.ne.s32.totalorder %s2925_s3, %s2695_s19  ;;  %s37_s16 = int_to_ptr.vmem [resolvable:$true] %s36_s16 }
  0x15   :  { %p2699_p9 = scmp.lt.u32.totalorder %s2695_s19, %s2925_s3 }
  0x17   :  { %p2701_p10 = pnand %p2699_p9, %p2696_p8 }
  0x19   :  { %2704 = shalt.err (!%p2701_p10)
}
  0x1a   :  { %s2705_s24 = scalar_lea.vmem %s37_s16, 3072  ;;  %p2710_p12 = scmp.lt.s32.totalorder %s37_s16, %s37_s16 }
  0x1b   :  { %p2706_p11 = scmp.ne.s32.totalorder %s37_s16, %s2705_s24  ;;  %p2711_p13 = scmp.lt.s32.totalorder %s2705_s24, %s2705_s24 }
  0x1d   :  { %p2712_p0 = por %p2711_p13, %p2710_p12 }
  0x1f   :  { %p2713_p1 = pnand %p2712_p0, %p2706_p11 }
  0x21   :  { %2716 = shalt.err (!%p2713_p1)
}
  0x22   :  { %s2749_s1 = smov 64   ;;  %s2750_s25 = smov 4  }
  0x23   :  { %42 = dma.hbm_to_vmem [thread:$0]  %s2925_s3, 3072, %s37_s16, [#allocation6], %s2749_s1, %s2749_s1, %s2750_s25  }
  0x24   :  { %2739 = dma.done.wait [#allocation3], 21504  }
  0x25   :  { %2740 = vsyncadd [#allocation3], 4294945792 }
  0x26   :  { %2741 = dma.done.wait [#allocation6], 3072  }
  0x27   :  { %2742 = vsyncadd [#allocation6], 4294964224  ;;  %v2390_v0 = vld [vmem:[#allocation2 + $0x4] ss:$12 sps:$4 sm:$0xff]   ;;  %v2392_v1 = vld [vmem:[#allocation2] ss:$12 sps:$4 sm:$0xff]  }
  0x28   :  { %1222 = vmatprep.subr.bf16.mxu0 %v2390_v0  ;;  %v2393_v2 = vld [vmem:[#allocation2 + $0x1c] ss:$12 sps:$4 sm:$0xff]   ;;  %v2395_v3 = vld [vmem:[#allocation2 + $0x18] ss:$12 sps:$4 sm:$0xff]   ;;  %v2396_v4 = vld [vmem:[#allocation2 + $0x34] ss:$12 sps:$4 sm:$0xff]  }
  0x29   :  { %1223 = vmatpush1.bf16.msra.mxu0 %v2392_v1  ;;  %v2398_v5 = vld [vmem:[#allocation2 + $0x30] ss:$12 sps:$4 sm:$0xff]   ;;  %v2399_v6 = vld [vmem:[#allocation2 + $0x4c] ss:$12 sps:$4 sm:$0xff]   ;;  %v2401_v7 = vld [vmem:[#allocation2 + $0x48] ss:$12 sps:$4 sm:$0xff]  }
  0x2a   :  { %1224 = vmatprep.subr.bf16.mxu0 %v2393_v2  ;;  %v2402_v8 = vld [vmem:[#allocation2 + $0x64] ss:$12 sps:$4 sm:$0xff]   ;;  %v2404_v9 = vld [vmem:[#allocation2 + $0x60] ss:$12 sps:$4 sm:$0xff]   ;;  %v2405_v10 = vld [vmem:[#allocation2 + $0x7c] ss:$12 sps:$4 sm:$0xff]  }
  0x2b   :  { %v2423_v11 = vld [vmem:[#allocation2 + $0xc8] ss:$12 sps:$4 sm:$0xff]   ;;  %v2407_v13 = vld [vmem:[#allocation2 + $0x78] ss:$12 sps:$4 sm:$0xff]   ;;  %v2428_v14 = vld [vmem:[#allocation2 + $0xe0] ss:$12 sps:$4 sm:$0xff]  }
  0x2c   :  { %v2424_v12 = vld [vmem:[#allocation2 + $0x8] ss:$12 sps:$4 sm:$0xff]   ;;  %2191 = vmatprep.subr.bf16.mxu1 %v2423_v11  ;;  %v2429_v15 = vld [vmem:[#allocation2 + $0x20] ss:$12 sps:$4 sm:$0xff]   ;;  %v2410_v17 = vld [vmem:[#allocation2 + $0x90] ss:$12 sps:$4 sm:$0xff]  }
  0x2d   :  { %1225 = vmatpush1.bf16.msra.mxu0 %v2395_v3  ;;  %2192 = vmatpush3.bf16.msra.mxu1 %v2424_v12  ;;  %v2408_v16 = vld [vmem:[#allocation2 + $0x94] ss:$12 sps:$4 sm:$0xff]   ;;  %v2433_v18 = vld [vmem:[#allocation2 + $0xf8] ss:$12 sps:$4 sm:$0xff]   ;;  %v2438_v21 = vld [vmem:[#allocation2 + $0x110] ss:$12 sps:$4 sm:$0xff]  }
  0x2e   :  { %1226 = vmatprep.subr.bf16.mxu0 %v2396_v4  ;;  %2193 = vmatprep.subr.bf16.mxu1 %v2428_v14  ;;  %v2434_v19 = vld [vmem:[#allocation2 + $0x38] ss:$12 sps:$4 sm:$0xff]   ;;  %v2439_v22 = vld [vmem:[#allocation2 + $0x50] ss:$12 sps:$4 sm:$0xff]   ;;  %v2413_v23 = vld [vmem:[#allocation2 + $0xa8] ss:$12 sps:$4 sm:$0xff]  }
  0x2f   :  { %v2411_v20 = vld [vmem:[#allocation2 + $0xac] ss:$12 sps:$4 sm:$0xff]   ;;  %v2414_v24 = vld [vmem:[#allocation2 + $0xc4] ss:$12 sps:$4 sm:$0xff]   ;;  %v2443_v25 = vld [vmem:[#allocation2 + $0x128] ss:$12 sps:$4 sm:$0xff]  }
  0x30   :  { %v2416_v26 = vld [vmem:[#allocation2 + $0xc0] ss:$12 sps:$4 sm:$0xff]   ;;  %v2444_v27 = vld [vmem:[#allocation2 + $0x68] ss:$12 sps:$4 sm:$0xff]   ;;  %v2419_v31 = vld [vmem:[#allocation2 + $0xd8] ss:$12 sps:$4 sm:$0xff]  }
  0x31   :  { %1227 = vmatpush1.bf16.msra.mxu0 %v2398_v5  ;;  %2194 = vmatpush3.bf16.msra.mxu1 %v2429_v15  ;;  %v2417_v28 = vld [vmem:[#allocation2 + $0xdc] ss:$12 sps:$4 sm:$0xff]   ;;  %v2448_v29 = vld [vmem:[#allocation2 + $0x140] ss:$12 sps:$4 sm:$0xff]   ;;  %v2455_v34 = vld [vmem:[#allocation2 + $0x158] ss:$12 sps:$4 sm:$0xff]  }
  0x32   :  { %1228 = vmatprep.subr.bf16.mxu0 %v2399_v6  ;;  %2195 = vmatprep.subr.bf16.mxu1 %v2433_v18  ;;  %v56_v30 = vld [vmem:[%s2922_s0] sm:$0xff]  ;;  %v2422_v36 = vld [vmem:[#allocation2 + $0xf0] ss:$12 sps:$4 sm:$0xff]   ;;  %v2425_v39 = vld [vmem:[#allocation2 + $0x10c] ss:$12 sps:$4 sm:$0xff]   ;;  %vm2752_vm0 = vmmov 0  }
  0x33   :  { %v2449_v32 = vld [vmem:[#allocation2 + $0x80] ss:$12 sps:$4 sm:$0xff]   ;;  %v1983_v33 = vcombine.high %v56_v30, %v56_v30  ;;  %v2456_v37 = vld [vmem:[#allocation2 + $0x98] ss:$12 sps:$4 sm:$0xff]   ;;  %v2460_v38 = vld [vmem:[#allocation2 + $0x170] ss:$12 sps:$4 sm:$0xff]   ;;  %v1982_v46 = vcombine.low %v56_v30, %v56_v30 }
  0x34   :  { %v2420_v35 = vld [vmem:[#allocation2 + $0xf4] ss:$12 sps:$4 sm:$0xff]   ;;  %v2461_v41 = vld [vmem:[#allocation2 + $0xb0] ss:$12 sps:$4 sm:$0xff]   ;;  %v2437_v50 = vld [vmem:[#allocation2 + $0x138] ss:$12 sps:$4 sm:$0xff]  }
  0x35   :  { %1229 = vmatpush1.bf16.msra.mxu0 %v2401_v7  ;;  %2196 = vmatpush3.bf16.msra.mxu1 %v2434_v19  ;;  %v2427_v40 = vld [vmem:[#allocation2 + $0x108] ss:$12 sps:$4 sm:$0xff]   ;;  %v2430_v43 = vld [vmem:[#allocation2 + $0x124] ss:$12 sps:$4 sm:$0xff]   ;;  %v2432_v44 = vld [vmem:[#allocation2 + $0x120] ss:$12 sps:$4 sm:$0xff]  }
  0x36   :  { %1230 = vmatprep.subr.bf16.mxu0 %v2402_v8  ;;  %2197 = vmatprep.subr.bf16.mxu1 %v2438_v21  ;;  %v2465_v42 = vld [vmem:[#allocation2 + $0x248] ss:$12 sps:$4 sm:$0xff]   ;;  %v2470_v47 = vld [vmem:[#allocation2 + $0x260] ss:$12 sps:$4 sm:$0xff]   ;;  %v2475_v51 = vld [vmem:[#allocation2 + $0x278] ss:$12 sps:$4 sm:$0xff]  }
  0x37   :  { %1254 = vmatprep.mubr.bf16.mxu0 %v1983_v33  ;;  %1418 = vmatprep.mubr.bf16.mxu1 %v1983_v33  ;;  %v2466_v45 = vld [vmem:[#allocation2 + $0x188] ss:$12 sps:$4 sm:$0xff]   ;;  %v2471_v49 = vld [vmem:[#allocation2 + $0x1a0] ss:$12 sps:$4 sm:$0xff]   ;;  %v2442_v53 = vld [vmem:[#allocation2 + $0x150] ss:$12 sps:$4 sm:$0xff]  }
  0x38   :  { %v2435_v48 = vld [vmem:[#allocation2 + $0x13c] ss:$12 sps:$4 sm:$0xff]   ;;  %v2440_v52 = vld [vmem:[#allocation2 + $0x154] ss:$12 sps:$4 sm:$0xff]   ;;  %v2476_v54 = vld [vmem:[#allocation2 + $0x1b8] ss:$12 sps:$4 sm:$0xff]  }
  0x39   :  { %1231 = vmatpush1.bf16.msra.mxu0 %v2404_v9  ;;  %2198 = vmatpush3.bf16.msra.mxu1 %v2439_v22  ;;  %v2480_v55 = vld [vmem:[#allocation2 + $0x290] ss:$12 sps:$4 sm:$0xff]   ;;  %v2445_v56 = vld [vmem:[#allocation2 + $0x16c] ss:$12 sps:$4 sm:$0xff]   ;;  %v2447_v57 = vld [vmem:[#allocation2 + $0x168] ss:$12 sps:$4 sm:$0xff]  }
  0x3a   :  { %1232 = vmatprep.subr.bf16.mxu0 %v2405_v10  ;;  %2199 = vmatprep.subr.bf16.mxu1 %v2443_v25  ;;  %v2481_v58 = vld [vmem:[#allocation2 + $0x1d0] ss:$12 sps:$4 sm:$0xff]   ;;  %v2485_v59 = vld [vmem:[#allocation2 + $0x2a8] ss:$12 sps:$4 sm:$0xff]   ;;  %v2452_v61 = vld [vmem:[#allocation2 + $0x180] ss:$12 sps:$4 sm:$0xff]  }
  0x3b   :  { %v2454_v60 = vld [vmem:[#allocation2 + $0x184] ss:$12 sps:$4 sm:$0xff]   ;;  %v2486_v62 = vld [vmem:[#allocation2 + $0x1e8] ss:$12 sps:$4 sm:$0xff]   ;;  %v2490_v63 = vld [vmem:[#allocation2 + $0x2c0] ss:$12 sps:$4 sm:$0xff]  }
  0x3c   :  { %v2459_v0 = vld [vmem:[#allocation2 + $0x19c] ss:$12 sps:$4 sm:$0xff]   ;;  %v2457_v1 = vld [vmem:[#allocation2 + $0x198] ss:$12 sps:$4 sm:$0xff]   ;;  %v2491_v2 = vld [vmem:[#allocation2 + $0x200] ss:$12 sps:$4 sm:$0xff]  }
  0x3d   :  { %1233 = vmatpush1.bf16.msra.mxu0 %v2407_v13  ;;  %2200 = vmatpush3.bf16.msra.mxu1 %v2444_v27  ;;  %v2495_v3 = vld [vmem:[#allocation2 + $0x2d8] ss:$12 sps:$4 sm:$0xff]   ;;  %v2464_v4 = vld [vmem:[#allocation2 + $0x1b4] ss:$12 sps:$4 sm:$0xff]   ;;  %v57_v5 = vld [vmem:[%s2922_s0 + $0x8] sm:$0xff] }
  0x3e   :  { %1234 = vmatprep.subr.bf16.mxu0 %v2408_v16  ;;  %2201 = vmatprep.subr.bf16.mxu1 %v2448_v29  ;;  %v1985_v6 = vcombine.high %v57_v5, %v57_v5  ;;  %v2496_v7 = vld [vmem:[#allocation2 + $0x218] ss:$12 sps:$4 sm:$0xff]   ;;  %v2462_v8 = vld [vmem:[#allocation2 + $0x1b0] ss:$12 sps:$4 sm:$0xff]   ;;  %v2467_v11 = vld [vmem:[#allocation2 + $0x1c8] ss:$12 sps:$4 sm:$0xff]   ;;  %v2825_v15 = vcombine.low %v57_v5, %v57_v5 }
  0x3f   :  { %v2500_v9 = vld [vmem:[#allocation2 + $0x2f0] ss:$12 sps:$4 sm:$0xff]   ;;  %v2469_v10 = vld [vmem:[#allocation2 + $0x1cc] ss:$12 sps:$4 sm:$0xff]   ;;  %v2507_v13 = vld [vmem:[#allocation2 + $0x3c8] ss:$12 sps:$4 sm:$0xff]  }
  0x40   :  { %v2501_v12 = vld [vmem:[#allocation2 + $0x230] ss:$12 sps:$4 sm:$0xff]   ;;  %v2472_v16 = vld [vmem:[#allocation2 + $0x1e0] ss:$12 sps:$4 sm:$0xff]   ;;  %v2517_v22 = vld [vmem:[#allocation2 + $0x3f8] ss:$12 sps:$4 sm:$0xff]  }
  0x41   :  { %1235 = vmatpush1.bf16.msra.mxu0 %v2410_v17  ;;  %2202 = vmatpush3.bf16.msra.mxu1 %v2449_v32  ;;  %v2474_v14 = vld [vmem:[#allocation2 + $0x1e4] ss:$12 sps:$4 sm:$0xff]   ;;  %v2508_v17 = vld [vmem:[#allocation2 + $0x308] ss:$12 sps:$4 sm:$0xff]   ;;  %v2512_v18 = vld [vmem:[#allocation2 + $0x3e0] ss:$12 sps:$4 sm:$0xff]  }
  0x42   :  { %1236 = vmatprep.subr.bf16.mxu0 %v2411_v20  ;;  %2203 = vmatprep.subr.bf16.mxu1 %v2455_v34  ;;  %v2479_v19 = vld [vmem:[#allocation2 + $0x1fc] ss:$12 sps:$4 sm:$0xff]   ;;  %v2477_v20 = vld [vmem:[#allocation2 + $0x1f8] ss:$12 sps:$4 sm:$0xff]   ;;  %v2513_v21 = vld [vmem:[#allocation2 + $0x320] ss:$12 sps:$4 sm:$0xff]  }
  0x43   :  { %v2518_v25 = vld [vmem:[#allocation2 + $0x338] ss:$12 sps:$4 sm:$0xff]   ;;  %v2487_v29 = vld [vmem:[#allocation2 + $0x228] ss:$12 sps:$4 sm:$0xff]   ;;  %v2492_v32 = vld [vmem:[#allocation2 + $0x240] ss:$12 sps:$4 sm:$0xff]  }
  0x44   :  { %v2489_v27 = vld [vmem:[#allocation2 + $0x22c] ss:$12 sps:$4 sm:$0xff]   ;;  %v2527_v30 = vld [vmem:[#allocation2 + $0x428] ss:$12 sps:$4 sm:$0xff]   ;;  %v2544_v5 = vld [vmem:[#allocation2 + $0x330] ss:$12 sps:$4 sm:$0xff]  }
  0x45   :  { %1237 = vmatpush1.bf16.msra.mxu0 %v2413_v23  ;;  %2204 = vmatpush3.bf16.msra.mxu1 %v2456_v37  ;;  %v2484_v23 = vld [vmem:[#allocation2 + $0x214] ss:$12 sps:$4 sm:$0xff]  }
  0x46   :  { %1238 = vmatprep.subr.bf16.mxu0 %v2414_v24  ;;  %2205 = vmatprep.subr.bf16.mxu1 %v2460_v38  ;;  %v2482_v24 = vld [vmem:[#allocation2 + $0x210] ss:$12 sps:$4 sm:$0xff]   ;;  %v2528_v33 = vld [vmem:[#allocation2 + $0x368] ss:$12 sps:$4 sm:$0xff]   ;;  %v2532_v34 = vld [vmem:[#allocation2 + $0x440] ss:$12 sps:$4 sm:$0xff]  }
  0x47   :  { %v2497_v38 = vld [vmem:[#allocation2 + $0x258] ss:$12 sps:$4 sm:$0xff]  }
  0x49   :  { %1239 = vmatpush1.bf16.msra.mxu0 %v2416_v26  ;;  %2206 = vmatpush3.bf16.msra.mxu1 %v2461_v41  ;;  %v2522_v26 = vld [vmem:[#allocation2 + $0x410] ss:$12 sps:$4 sm:$0xff]   ;;  %v2504_v41 = vld [vmem:[#allocation2 + $0x274] ss:$12 sps:$4 sm:$0xff]  }
  0x4a   :  { %1240 = vmatprep.subr.bf16.mxu0 %v2417_v28  ;;  %2213 = vmatprep.subr.bf16.mxu1 %v2465_v42  ;;  %v2523_v28 = vld [vmem:[#allocation2 + $0x350] ss:$12 sps:$4 sm:$0xff]  }
  0x4b   :  { %v2502_v42 = vld [vmem:[#allocation2 + $0x270] ss:$12 sps:$4 sm:$0xff]  }
  0x4c   :  { %1419 = vmatmul.mubr.bf16.vlgmr.msra.gmra.mrb[0].mxu1 %v1982_v46 }
  0x4d   :  { %1241 = vmatpush1.bf16.msra.mxu0 %v2419_v31  ;;  %2214 = vmatpush3.bf16.msra.mxu1 %v2466_v45  ;;  %v2494_v31 = vld [vmem:[#allocation2 + $0x244] ss:$12 sps:$4 sm:$0xff]   ;;  %v2511_v45 = vld [vmem:[#allocation2 + $0x28c] ss:$12 sps:$4 sm:$0xff]  }
  0x4e   :  { %1242 = vmatprep.subr.bf16.mxu0 %v2420_v35  ;;  %2215 = vmatprep.subr.bf16.mxu1 %v2470_v47  ;;  %v58_v35 = vld [vmem:[%s2922_s0 + $0x10] sm:$0xff] }
  0x4f   :  { %1458 = vmatprep.mubr.bf16.mxu1 %v1985_v6  ;;  %v2831_v37 = vcombine.high %v58_v35, %v58_v35  ;;  %v2509_v47 = vld [vmem:[#allocation2 + $0x288] ss:$12 sps:$4 sm:$0xff]  }
  0x51   :  { %1243 = vmatpush1.bf16.msra.mxu0 %v2422_v36  ;;  %2216 = vmatpush3.bf16.msra.mxu1 %v2471_v49  ;;  %v2499_v36 = vld [vmem:[#allocation2 + $0x25c] ss:$12 sps:$4 sm:$0xff]   ;;  %v2834_v49 = vcombine.low %v58_v35, %v58_v35  ;;  %v2599_v35 = vld [vmem:[#allocation2 + $0x484] ss:$12 sps:$4 sm:$0xff]  }
  0x52   :  { %1244 = vmatprep.subr.bf16.mxu0 %v2425_v39  ;;  %2217 = vmatprep.subr.bf16.mxu1 %v2475_v51  ;;  %v2533_v39 = vld [vmem:[#allocation2 + $0x380] ss:$12 sps:$4 sm:$0xff]  }
  0x53   :  { %v2514_v51 = vld [vmem:[#allocation2 + $0x2a0] ss:$12 sps:$4 sm:$0xff]  }
  0x55   :  { %1245 = vmatpush1.bf16.msra.mxu0 %v2427_v40  ;;  %2218 = vmatpush3.bf16.msra.mxu1 %v2476_v54  ;;  %v2537_v40 = vld [vmem:[#allocation2 + $0x458] ss:$12 sps:$4 sm:$0xff]   ;;  %v2553_v54 = vld [vmem:[#allocation2 + $0x4a0] ss:$12 sps:$4 sm:$0xff]  }
  0x56   :  { %1246 = vmatprep.subr.bf16.mxu0 %v2430_v43  ;;  %2219 = vmatprep.subr.bf16.mxu1 %v2480_v55  ;;  %v2538_v43 = vld [vmem:[#allocation2 + $0x398] ss:$12 sps:$4 sm:$0xff]  }
  0x57   :  { %v2519_v55 = vld [vmem:[#allocation2 + $0x2b8] ss:$12 sps:$4 sm:$0xff]  }
  0x59   :  { %1247 = vmatpush1.bf16.msra.mxu0 %v2432_v44  ;;  %2220 = vmatpush3.bf16.msra.mxu1 %v2481_v58  ;;  %v2542_v44 = vld [vmem:[#allocation2 + $0x470] ss:$12 sps:$4 sm:$0xff]  }
  0x5a   :  { %1248 = vmatprep.subr.bf16.mxu0 %v2435_v48  ;;  %2221 = vmatprep.subr.bf16.mxu1 %v2485_v59  ;;  %v2516_v48 = vld [vmem:[#allocation2 + $0x2a4] ss:$12 sps:$4 sm:$0xff]   ;;  %v2531_v59 = vld [vmem:[#allocation2 + $0x2ec] ss:$12 sps:$4 sm:$0xff]  }
  0x5b   :  { %v2524_v58 = vld [vmem:[#allocation2 + $0x2d0] ss:$12 sps:$4 sm:$0xff]  }
  0x5d   :  { %1249 = vmatpush1.bf16.msra.mxu0 %v2437_v50  ;;  %2222 = vmatpush3.bf16.msra.mxu1 %v2486_v62  ;;  %v2549_v50 = vld [vmem:[#allocation2 + $0x488] ss:$12 sps:$4 sm:$0xff]   ;;  %v2536_v62 = vld [vmem:[#allocation2 + $0x304] ss:$12 sps:$4 sm:$0xff]  }
  0x5e   :  { %1250 = vmatprep.subr.bf16.mxu0 %v2440_v52  ;;  %2223 = vmatprep.subr.bf16.mxu1 %v2490_v63  ;;  %v2751_v52 = vmov 0.0   ;;  %v2565_v63 = vld [vmem:[#allocation2 + $0x4e8] ss:$12 sps:$4 sm:$0xff]  }
  0x61   :  { %1251 = vmatpush1.bf16.msra.mxu0 %v2442_v53  ;;  %2224 = vmatpush3.bf16.msra.mxu1 %v2491_v2  ;;  %v2521_v53 = vld [vmem:[#allocation2 + $0x2bc] ss:$12 sps:$4 sm:$0xff]   ;;  %v2569_v2 = vld [vmem:[#allocation2 + $0x500] ss:$12 sps:$4 sm:$0xff]  }
  0x62   :  { %1252 = vmatprep.subr.bf16.mxu0 %v2445_v56  ;;  %2225 = vmatprep.subr.bf16.mxu1 %v2495_v3  ;;  %v2526_v56 = vld [vmem:[#allocation2 + $0x2d4] ss:$12 sps:$4 sm:$0xff]   ;;  %v2539_v3 = vld [vmem:[#allocation2 + $0x318] ss:$12 sps:$4 sm:$0xff]  }
  0x65   :  { %1253 = vmatpush1.bf16.msra.mxu0 %v2447_v57  ;;  %2226 = vmatpush3.bf16.msra.mxu1 %v2496_v7  ;;  %v2557_v57 = vld [vmem:[#allocation2 + $0x4b8] ss:$12 sps:$4 sm:$0xff]  }
  0x66   :  { %1263 = vmatprep.subr.bf16.mxu0 %v2454_v60  ;;  %2227 = vmatprep.subr.bf16.mxu1 %v2500_v9  ;;  %v2561_v60 = vld [vmem:[#allocation2 + $0x4d0] ss:$12 sps:$4 sm:$0xff]   ;;  %v2573_v7 = vld [vmem:[#allocation2 + $0x518] ss:$12 sps:$4 sm:$0xff]   ;;  %v2550_v9 = vld [vmem:[#allocation2 + $0x348] ss:$12 sps:$4 sm:$0xff]  }
  0x68   :  { %1255 = vmatmul.mubr.bf16.vlgmr.msra.gmra.mrb[0].mxu0 %v1982_v46  ;;  %v2543_v46 = vld [vmem:[#allocation2 + $0x3b0] ss:$12 sps:$4 sm:$0xff]  }
  0x69   :  { %1264 = vmatpush1.bf16.msra.mxu0 %v2452_v61  ;;  %1295 = vmatprep.mubr.bf16.mxu0 %v1985_v6  ;;  %v2529_v61 = vld [vmem:[#allocation2 + $0x2e8] ss:$12 sps:$4 sm:$0xff]   ;;  %v2552_v6 = vld [vmem:[#allocation2 + $0x34c] ss:$12 sps:$4 sm:$0xff]  }
  0x6a   :  { %1265 = vmatprep.subr.bf16.mxu0 %v2459_v0  ;;  %2228 = vmatpush3.bf16.msra.mxu1 %v2501_v12  ;;  %v2534_v0 = vld [vmem:[#allocation2 + $0x300] ss:$12 sps:$4 sm:$0xff]  }
  0x6b   :  { %2235 = vmatprep.subr.bf16.mxu1 %v2507_v13  ;;  %v2554_v12 = vld [vmem:[#allocation2 + $0x360] ss:$12 sps:$4 sm:$0xff]   ;;  %v2560_v13 = vld [vmem:[#allocation2 + $0x37c] ss:$12 sps:$4 sm:$0xff]  }
  0x6d   :  { %1266 = vmatpush1.bf16.msra.mxu0 %v2457_v1  ;;  %1459 = vmatmul.mubr.bf16.vlgmr.msra.gmra.mrb[4].mxu1 %v2825_v15  ;;  %v2541_v1 = vld [vmem:[#allocation2 + $0x31c] ss:$12 sps:$4 sm:$0xff]  }
  0x6e   :  { %1267 = vmatprep.subr.bf16.mxu0 %v2464_v4  ;;  %2236 = vmatpush3.bf16.msra.mxu1 %v2508_v17  ;;  %v2546_v4 = vld [vmem:[#allocation2 + $0x334] ss:$12 sps:$4 sm:$0xff]   ;;  %v2568_v17 = vld [vmem:[#allocation2 + $0x3ac] ss:$12 sps:$4 sm:$0xff]  }
  0x6f   :  { %2237 = vmatprep.subr.bf16.mxu1 %v2512_v18  ;;  %1498 = vmatprep.mubr.bf16.mxu1 %v2831_v37  ;;  %v2566_v18 = vld [vmem:[#allocation2 + $0x3a8] ss:$12 sps:$4 sm:$0xff]  }
  0x71   :  { %1268 = vmatpush1.bf16.msra.mxu0 %v2462_v8  ;;  %v2577_v8 = vld [vmem:[#allocation2 + $0x530] ss:$12 sps:$4 sm:$0xff]  }
  0x72   :  { %1269 = vmatprep.subr.bf16.mxu0 %v2469_v10  ;;  %2238 = vmatpush3.bf16.msra.mxu1 %v2513_v21  ;;  %v2556_v10 = vld [vmem:[#allocation2 + $0x364] ss:$12 sps:$4 sm:$0xff]   ;;  %v2576_v21 = vld [vmem:[#allocation2 + $0x3dc] ss:$12 sps:$4 sm:$0xff]  }
  0x73   :  { %2239 = vmatprep.subr.bf16.mxu1 %v2517_v22  ;;  %v2574_v22 = vld [vmem:[#allocation2 + $0x3d8] ss:$12 sps:$4 sm:$0xff]  }
  0x75   :  { %1270 = vmatpush1.bf16.msra.mxu0 %v2467_v11  ;;  %v2852_v11 = vld [vmem:[%s2922_s0 + $0x18] ss:$0 sps:$4 sm:$0xff]  }
  0x76   :  { %1271 = vmatprep.subr.bf16.mxu0 %v2474_v14  ;;  %2240 = vmatpush3.bf16.msra.mxu1 %v2518_v25  ;;  %v2558_v14 = vld [vmem:[#allocation2 + $0x378] ss:$12 sps:$4 sm:$0xff]  }
  0x77   :  { %2241 = vmatprep.subr.bf16.mxu1 %v2522_v26  ;;  %v2584_v25 = vld [vmem:[#allocation2 + $0x40c] ss:$12 sps:$4 sm:$0xff]   ;;  %v2582_v26 = vld [vmem:[#allocation2 + $0x408] ss:$12 sps:$4 sm:$0xff]  }
  0x79   :  { %1272 = vmatpush1.bf16.msra.mxu0 %v2472_v16  ;;  %v2562_v16 = vld [vmem:[#allocation2 + $0x390] ss:$12 sps:$4 sm:$0xff]  }
  0x7a   :  { %1273 = vmatprep.subr.bf16.mxu0 %v2479_v19  ;;  %2242 = vmatpush3.bf16.msra.mxu1 %v2523_v28  ;;  %v2572_v19 = vld [vmem:[#allocation2 + $0x3c4] ss:$12 sps:$4 sm:$0xff]   ;;  %v2585_v28 = vld [vmem:[#allocation2 + $0x420] ss:$12 sps:$4 sm:$0xff]  }
  0x7b   :  { %2243 = vmatprep.subr.bf16.mxu1 %v2527_v30  ;;  %v2588_v30 = vld [vmem:[#allocation2 + $0x438] ss:$12 sps:$4 sm:$0xff]  }
  0x7d   :  { %1274 = vmatpush1.bf16.msra.mxu0 %v2477_v20  ;;  %v2570_v20 = vld [vmem:[#allocation2 + $0x3c0] ss:$12 sps:$4 sm:$0xff]  }
  0x7e   :  { %1275 = vmatprep.subr.bf16.mxu0 %v2484_v23  ;;  %2244 = vmatpush3.bf16.msra.mxu1 %v2528_v33  ;;  %v2580_v23 = vld [vmem:[#allocation2 + $0x3f4] ss:$12 sps:$4 sm:$0xff]   ;;  %v2596_v33 = vld [vmem:[#allocation2 + $0x46c] ss:$12 sps:$4 sm:$0xff]  }
  0x7f   :  { %2245 = vmatprep.subr.bf16.mxu1 %v2532_v34  ;;  %v2594_v34 = vld [vmem:[#allocation2 + $0x468] ss:$12 sps:$4 sm:$0xff]  }
  0x81   :  { %1276 = vmatpush1.bf16.msra.mxu0 %v2482_v24  ;;  %v2578_v24 = vld [vmem:[#allocation2 + $0x3f0] ss:$12 sps:$4 sm:$0xff]  }
  0x82   :  { %1277 = vmatprep.subr.bf16.mxu0 %v2489_v27  ;;  %2246 = vmatpush3.bf16.msra.mxu1 %v2533_v39  ;;  %v2587_v27 = vld [vmem:[#allocation2 + $0x424] ss:$12 sps:$4 sm:$0xff]   ;;  %v2753_v39 = vmov 0  }
  0x83   :  { %2247 = vmatprep.subr.bf16.mxu1 %v2537_v40  ;;  %v2605_v40 = vld [vmem:[#allocation2 + $0x4b4] ss:$12 sps:$4 sm:$0xff]  }
  0x85   :  { %1278 = vmatpush1.bf16.msra.mxu0 %v2487_v29  ;;  %v2590_v29 = vld [vmem:[#allocation2 + $0x43c] ss:$12 sps:$4 sm:$0xff]  }
  0x86   :  { %1279 = vmatprep.subr.bf16.mxu0 %v2494_v31  ;;  %2248 = vmatpush3.bf16.msra.mxu1 %v2538_v43  ;;  %v2593_v31 = vld [vmem:[#allocation2 + $0x454] ss:$12 sps:$4 sm:$0xff]  }
  0x87   :  { %2249 = vmatprep.subr.bf16.mxu1 %v2542_v44  ;;  %v2606_v43 = vld [vmem:[#allocation2 + $0x4c8] ss:$12 sps:$4 sm:$0xff]   ;;  %v2611_v44 = vld [vmem:[#allocation2 + $0x4e4] ss:$12 sps:$4 sm:$0xff]  }
  0x89   :  { %1280 = vmatpush1.bf16.msra.mxu0 %v2492_v32  ;;  %v2591_v32 = vld [vmem:[#allocation2 + $0x450] ss:$12 sps:$4 sm:$0xff]  }
  0x8a   :  { %1281 = vmatprep.subr.bf16.mxu0 %v2499_v36  ;;  %2250 = vmatpush3.bf16.msra.mxu1 %v2543_v46  ;;  %v2597_v36 = vld [vmem:[#allocation2 + $0x480] ss:$12 sps:$4 sm:$0xff]   ;;  %v2614_v46 = vld [vmem:[#allocation2 + $0x4fc] ss:$12 sps:$4 sm:$0xff]  }
  0x8b   :  { %2306 = vmatprep.subr.bf16.mxu1 %v2751_v52 }
  0x8d   :  { %1282 = vmatpush1.bf16.msra.mxu0 %v2497_v38  ;;  %1499 = vmatmul.mubr.bf16.vlgmr.msra.gmra.mrb[8].mxu1 %v2834_v49  ;;  %v2600_v38 = vld [vmem:[#allocation2 + $0x498] ss:$12 sps:$4 sm:$0xff]  }
  0x8e   :  { %1283 = vmatprep.subr.bf16.mxu0 %v2504_v41  ;;  %2307 = vmatpush3.bf16.msra.mxu1 %v2549_v50  ;;  %v2603_v41 = vld [vmem:[#allocation2 + $0x4b0] ss:$12 sps:$4 sm:$0xff]   ;;  %v2620_v50 = vld [vmem:[#allocation2 + $0x52c] ss:$12 sps:$4 sm:$0xff]  }
  0x8f   :  { %2322 = vmatprep.mubr.msk.bf16.mxu1 %vm2752_vm0, %v2751_v52  ;;  %2308 = vmatprep.subr.bf16.mxu1 %v2751_v52 }
  0x91   :  { %1284 = vmatpush1.bf16.msra.mxu0 %v2502_v42  ;;  %v2608_v42 = vld [vmem:[#allocation2 + $0x4cc] ss:$12 sps:$4 sm:$0xff]  }
  0x92   :  { %1285 = vmatprep.subr.bf16.mxu0 %v2511_v45  ;;  %2309 = vmatpush3.bf16.msra.mxu1 %v2553_v54  ;;  %v2609_v45 = vld [vmem:[#allocation2 + $0x4e0] ss:$12 sps:$4 sm:$0xff]  }
  0x93   :  { %2310 = vmatprep.subr.bf16.mxu1 %v2751_v52 }
  0x95   :  { %1286 = vmatpush1.bf16.msra.mxu0 %v2509_v47  ;;  %v2612_v47 = vld [vmem:[#allocation2 + $0x4f8] ss:$12 sps:$4 sm:$0xff]  }
  0x96   :  { %1287 = vmatprep.subr.bf16.mxu0 %v2516_v48  ;;  %2311 = vmatpush3.bf16.msra.mxu1 %v2557_v57  ;;  %v2617_v48 = vld [vmem:[#allocation2 + $0x514] ss:$12 sps:$4 sm:$0xff]  }
  0x97   :  { %2312 = vmatprep.subr.bf16.mxu1 %v2751_v52 }
  0x99   :  { %1288 = vmatpush1.bf16.msra.mxu0 %v2514_v51  ;;  %v2618_v51 = vld [vmem:[#allocation2 + $0x528] ss:$12 sps:$4 sm:$0xff]  }
  0x9a   :  { %1289 = vmatprep.subr.bf16.mxu0 %v2521_v53  ;;  %2313 = vmatpush3.bf16.msra.mxu1 %v2561_v60 }
  0x9b   :  { %2314 = vmatprep.subr.bf16.mxu1 %v2751_v52 }
  0x9d   :  { %1290 = vmatpush1.bf16.msra.mxu0 %v2519_v55 }
  0x9e   :  { %1291 = vmatprep.subr.bf16.mxu0 %v2526_v56  ;;  %2315 = vmatpush3.bf16.msra.mxu1 %v2565_v63 }
  0x9f   :  { %2316 = vmatprep.subr.bf16.mxu1 %v2751_v52 }
  0xa1   :  { %1292 = vmatpush1.bf16.msra.mxu0 %v2524_v58  ;;  %v286_v58 = vlaneseq }
  0xa2   :  { %1293 = vmatprep.subr.bf16.mxu0 %v2531_v59  ;;  %2317 = vmatpush3.bf16.msra.mxu1 %v2569_v2 }
  0xa3   :  { %2318 = vmatprep.subr.bf16.mxu1 %v2751_v52  ;;  %v287_v59 = vshrl.u32 %v286_v58, 7 }
  0xa5   :  { %1294 = vmatpush1.bf16.msra.mxu0 %v2529_v61  ;;  %v296_v60 = vsub.s32 2, %v287_v59  ;;  %v284_v61 = vld [vmem:[%s2924_s2] sm:$0x7] }
  0xa6   :  { %1304 = vmatprep.subr.bf16.mxu0 %v2536_v62  ;;  %2319 = vmatpush3.bf16.msra.mxu1 %v2573_v7  ;;  %v2622_v7 = vld [vmem:[#allocation5] sm:$0xff]  }
  0xa7   :  { %2320 = vmatprep.subr.bf16.mxu1 %v2751_v52  ;;  %v297_v62 = vrot.slane %v284_v61, %v296_v60  ;;  %v2639_v60 = vld [vmem:[#allocation5 + $0x90] sm:$0xff]  }
  0xa8   :  { %1296 = vmatmul.mubr.bf16.vlgmr.msra.gmra.mrb[0].mxu0 %v2825_v15  ;;  %v2564_v15 = vld [vmem:[#allocation2 + $0x394] ss:$12 sps:$4 sm:$0xff]  }
  0xa9   :  { %1305 = vmatpush1.bf16.msra.mxu0 %v2534_v0  ;;  %1336 = vmatprep.mubr.bf16.mxu0 %v2831_v37  ;;  %v2602_v37 = vld [vmem:[#allocation2 + $0x49c] ss:$12 sps:$4 sm:$0xff]  }
  0xaa   :  { %1306 = vmatprep.subr.bf16.mxu0 %v2541_v1  ;;  %2321 = vmatpush3.bf16.msra.mxu1 %v2577_v8  ;;  %v2623_v8 = vld [vmem:[#allocation5 + $0x48] sm:$0xff]  }
  0xad   :  { %1307 = vmatpush1.bf16.msra.mxu0 %v2539_v3  ;;  %2323 = vmatmul.mubr.bf16.vlgmr.msra.gmra.mrb[12].mxu1 %v2852_v11 }
  0xae   :  { %1308 = vmatprep.subr.bf16.mxu0 %v2546_v4 }
  0xb1   :  { %1309 = vmatpush1.bf16.msra.mxu0 %v2544_v5 }
  0xb2   :  { %1310 = vmatprep.subr.bf16.mxu0 %v2552_v6  ;;  %v2621_v6 = vld [vmem:[#allocation5 + $0x40] sm:$0xff]  }
  0xb3   :  { %2266 = vmatprep.subr.bf16.mxu1 %v2621_v6  ;;  %v2645_v6 = vld [vmem:[%s2927_s5] sm:$0xff]  }
  0xb4   :  { %2267 = vmatpush3.bf16.msra.mxu1 %v2622_v7  ;;  %v2646_v7 = vld [vmem:[%s2927_s5 + $0x8] sm:$0xff]  }
  0xb5   :  { %1311 = vmatpush1.bf16.msra.mxu0 %v2550_v9  ;;  %v2624_v9 = vld [vmem:[#allocation5 + $0x8] sm:$0xff]   ;;  %2268 = vmatprep.subr.bf16.mxu1 %v2623_v8  ;;  %v2647_v8 = vld [vmem:[%s2927_s5 + $0x10] sm:$0xff]  }
  0xb6   :  { %1312 = vmatprep.subr.bf16.mxu0 %v2556_v10  ;;  %v2625_v10 = vld [vmem:[#allocation5 + $0x50] sm:$0xff]  }
  0xb8   :  { %2269 = vmatpush3.bf16.msra.mxu1 %v2624_v9  ;;  %v2648_v9 = vld [vmem:[%s2927_s5 + $0x18] sm:$0xff]  }
  0xb9   :  { %1313 = vmatpush1.bf16.msra.mxu0 %v2554_v12  ;;  %2270 = vmatprep.subr.bf16.mxu1 %v2625_v10  ;;  %v2627_v12 = vld [vmem:[#allocation5 + $0x58] sm:$0xff]   ;;  %v2649_v10 = vld [vmem:[%s2927_s5 + $0x20] sm:$0xff]  }
  0xba   :  { %1314 = vmatprep.subr.bf16.mxu0 %v2560_v13  ;;  %v2628_v13 = vld [vmem:[#allocation5 + $0x18] sm:$0xff]  }
  0xbd   :  { %1315 = vmatpush1.bf16.msra.mxu0 %v2558_v14 }
  0xbe   :  { %1316 = vmatprep.subr.bf16.mxu0 %v2564_v15 }
  0xc1   :  { %1317 = vmatpush1.bf16.msra.mxu0 %v2562_v16  ;;  %v2629_v16 = vld [vmem:[#allocation5 + $0x60] sm:$0xff]  }
  0xc2   :  { %1318 = vmatprep.subr.bf16.mxu0 %v2568_v17 }
  0xc5   :  { %1319 = vmatpush1.bf16.msra.mxu0 %v2566_v18 }
  0xc6   :  { %1320 = vmatprep.subr.bf16.mxu0 %v2572_v19  ;;  %v2630_v19 = vld [vmem:[#allocation5 + $0x20] sm:$0xff]  }
  0xc9   :  { %1321 = vmatpush1.bf16.msra.mxu0 %v2570_v20 }
  0xca   :  { %1322 = vmatprep.subr.bf16.mxu0 %v2576_v21 }
  0xcd   :  { %1323 = vmatpush1.bf16.msra.mxu0 %v2574_v22  ;;  %v2631_v22 = vld [vmem:[#allocation5 + $0x68] sm:$0xff]  }
  0xce   :  { %1324 = vmatprep.subr.bf16.mxu0 %v2580_v23  ;;  %v2632_v23 = vld [vmem:[#allocation5 + $0x28] sm:$0xff]  }
  0xd1   :  { %1325 = vmatpush1.bf16.msra.mxu0 %v2578_v24  ;;  %v2633_v24 = vld [vmem:[#allocation5 + $0x70] sm:$0xff]  }
  0xd2   :  { %1326 = vmatprep.subr.bf16.mxu0 %v2584_v25  ;;  %v2634_v25 = vld [vmem:[#allocation5 + $0x30] sm:$0xff]  }
  0xd5   :  { %1327 = vmatpush1.bf16.msra.mxu0 %v2582_v26  ;;  %v2635_v26 = vld [vmem:[#allocation5 + $0x78] sm:$0xff]  }
  0xd6   :  { %1328 = vmatprep.subr.bf16.mxu0 %v2587_v27  ;;  %v2636_v27 = vld [vmem:[#allocation5 + $0x38] sm:$0xff]  }
  0xd9   :  { %1329 = vmatpush1.bf16.msra.mxu0 %v2585_v28 }
  0xda   :  { %1330 = vmatprep.subr.bf16.mxu0 %v2590_v29 }
  0xdd   :  { %1331 = vmatpush1.bf16.msra.mxu0 %v2588_v30 }
  0xde   :  { %1332 = vmatprep.subr.bf16.mxu0 %v2593_v31 }
  0xe1   :  { %1333 = vmatpush1.bf16.msra.mxu0 %v2591_v32 }
  0xe2   :  { %1334 = vmatprep.subr.bf16.mxu0 %v2596_v33  ;;  %v288_v33 = vsub.s32 0, %v287_v59 }
  0xe5   :  { %1335 = vmatpush1.bf16.msra.mxu0 %v2594_v34  ;;  %v292_v34 = vsub.s32 1, %v287_v59  ;;  %v2638_v59 = vld [vmem:[#allocation5 + $0x88] sm:$0xff]  }
  0xe6   :  { %1345 = vmatprep.subr.bf16.mxu0 %v2599_v35  ;;  %v289_v35 = vrot.slane %v284_v61, %v288_v33 }
  0xe8   :  { %1337 = vmatmul.mubr.bf16.vlgmr.msra.gmra.mrb[0].mxu0 %v2834_v49  ;;  %v2615_v49 = vld [vmem:[#allocation2 + $0x510] ss:$12 sps:$4 sm:$0xff]  }
  0xe9   :  { %1346 = vmatpush1.bf16.msra.mxu0 %v2597_v36  ;;  %1377 = vmatprep.mubr.bf16.mxu0 %v2753_v39  ;;  %v293_v36 = vrot.slane %v284_v61, %v292_v34  ;;  %v2640_v61 = vld [vmem:[#allocation5 + $0x98] sm:$0xff]  }
  0xea   :  { %1347 = vmatprep.subr.bf16.mxu0 %v2602_v37 }
  0xed   :  { %1348 = vmatpush1.bf16.msra.mxu0 %v2600_v38 }
  0xee   :  { %1349 = vmatprep.subr.bf16.mxu0 %v2605_v40 }
  0xf1   :  { %1350 = vmatpush1.bf16.msra.mxu0 %v2603_v41 }
  0xf2   :  { %1351 = vmatprep.subr.bf16.mxu0 %v2608_v42 }
  0xf5   :  { %1352 = vmatpush1.bf16.msra.mxu0 %v2606_v43 }
  0xf6   :  { %1353 = vmatprep.subr.bf16.mxu0 %v2611_v44 }
  0xf9   :  { %1354 = vmatpush1.bf16.msra.mxu0 %v2609_v45 }
  0xfa   :  { %1355 = vmatprep.subr.bf16.mxu0 %v2614_v46 }
  0xfd   :  { %1356 = vmatpush1.bf16.msra.mxu0 %v2612_v47 }
  0xfe   :  { %1357 = vmatprep.subr.bf16.mxu0 %v2617_v48 }
 0x101   :  { %1358 = vmatpush1.bf16.msra.mxu0 %v2615_v49 }
 0x102   :  { %1359 = vmatprep.subr.bf16.mxu0 %v2620_v50 }
 0x105   :  { %1360 = vmatpush1.bf16.msra.mxu0 %v2618_v51 }
 0x108   :  { %1378 = vmatmul.mubr.bf16.vlgmr.msra.gmra.mrb[0].mxu0 %v2852_v11  ;;  %v2626_v11 = vld [vmem:[#allocation5 + $0x10] sm:$0xff]  }
 0x109   :  { %2271 = vmatpush3.bf16.msra.mxu1 %v2626_v11  ;;  %v2650_v11 = vld [vmem:[%s2927_s5 + $0x28] sm:$0xff]  }
 0x10a   :  { %2272 = vmatprep.subr.bf16.mxu1 %v2627_v12  ;;  %v2651_v12 = vld [vmem:[%s2927_s5 + $0x30] sm:$0xff]  }
 0x10d   :  { %2273 = vmatpush3.bf16.msra.mxu1 %v2628_v13  ;;  %v2652_v13 = vld [vmem:[%s2927_s5 + $0x38] sm:$0xff]  }
 0x10e   :  { %2274 = vmatprep.subr.bf16.mxu1 %v2629_v16 }
 0x111   :  { %2275 = vmatpush3.bf16.msra.mxu1 %v2630_v19  ;;  %v2157_v19 = vld [vmem:[%s2926_s4] ss:$0 sm:$0xff]  ;;  %s2754_s4 = smov [#allocation7]  }
 0x112   :  { %2276 = vmatprep.subr.bf16.mxu1 %v2631_v22  ;;  %s1972_s29 = sshll.u32 %s2754_s4, 4  ;;  %s1973_s29 = int_to_ptr.vmem [resolvable:$true] %s1972_s29 }
 0x113   :  { %s2717_s30 = scalar_lea.vmem %s1973_s29, 128  ;;  %p2722_p3 = scmp.lt.s32.totalorder %s1973_s29, %s1973_s29 }
 0x114   :  { %p2718_p2 = scmp.ne.s32.totalorder %s1973_s29, %s2717_s30  ;;  %p2723_p4 = scmp.lt.s32.totalorder %s2717_s30, %s2717_s30 }
 0x115   :  { %2277 = vmatpush3.bf16.msra.mxu1 %v2632_v23 }
 0x116   :  { %2278 = vmatprep.subr.bf16.mxu1 %v2633_v24  ;;  %p2724_p5 = por %p2723_p4, %p2722_p3 }
 0x118   :  { %p2725_p6 = pnand %p2724_p5, %p2718_p2 }
 0x119   :  { %2279 = vmatpush3.bf16.msra.mxu1 %v2634_v25 }
 0x11a   :  { %2280 = vmatprep.subr.bf16.mxu1 %v2635_v26 }
 0x11d   :  { %2281 = vmatpush3.bf16.msra.mxu1 %v2636_v27 }
 0x11e   :  { %2326 = vmatprep.subr.bf16.mxu1 %v2751_v52 }
 0x11f   :  { %v2207_v53 = vpop.f32.mrb[0].mxu1 }
 0x120   :  { %v2208_v54 = vpop.f32.mrb[1].mxu1 }
 0x121   :  { %v2209_v55 = vadd.f32 %v2208_v54, %v2207_v53  ;;  %v2210_v56 = vpop.f32.mrb[2].mxu1 }
 0x122   :  { %v2211_v57 = vpop.f32.mrb[3].mxu1 }
 0x123   :  { %v1421_v63 = vadd.f32 %v2209_v55, %v297_v62  ;;  %v2637_v57 = vld [vmem:[#allocation5 + $0x80] sm:$0xff]  }
 0x140   :  { %v2229_v0 = vpop.f32.mrb[4].mxu1 }
 0x141   :  { %v2230_v1 = vpop.f32.mrb[5].mxu1 }
 0x142   :  { %v2231_v2 = vadd.f32 %v2230_v1, %v2229_v0  ;;  %v2232_v3 = vpop.f32.mrb[6].mxu1  ;;  %v2641_v0 = vld [vmem:[#allocation5 + $0xa0] sm:$0xff]   ;;  %v2642_v1 = vld [vmem:[#allocation5 + $0xa8] sm:$0xff]  }
 0x143   :  { %v2233_v4 = vpop.f32.mrb[7].mxu1  ;;  %v2644_v3 = vld [vmem:[#allocation5 + $0xb8] sm:$0xff]  }
 0x144   :  { %v1461_v5 = vadd.f32 %v2231_v2, %v1421_v63  ;;  %v2643_v2 = vld [vmem:[#allocation5 + $0xb0] sm:$0xff]  }
 0x160   :  { %v2251_v14 = vpop.f32.mrb[8].mxu1 }
 0x161   :  { %v2252_v15 = vpop.f32.mrb[9].mxu1 }
 0x162   :  { %v2253_v17 = vadd.f32 %v2252_v15, %v2251_v14  ;;  %v2254_v18 = vpop.f32.mrb[10].mxu1 }
 0x163   :  { %v2255_v20 = vpop.f32.mrb[11].mxu1 }
 0x164   :  { %v1501_v21 = vadd.f32 %v2253_v17, %v1461_v5 }
 0x180   :  { %v1540_v28 = vpop.f32.mrb[12].mxu1 }
 0x181   :  { %v1541_v29 = vadd.f32 %v1540_v28, %v1501_v21  ;;  %v2324_v30 = vpop.f32.mrb[13].mxu1 }
 0x182   :  { %v1543_v31 = vpop.f32.mrb[14].mxu1 }
 0x183   :  { %v2325_v32 = vpop.f32.mrb[15].mxu1  ;;  %v1548_v51 = vsub.f32 0.0, %v1541_v29  ;;  %v2182_v31 = vld [vmem:[%s2928_s6] ss:$0 sm:$0xff] }
 0x185   :  { %v1553_v55 = vmul.f32 1.442695, %v1548_v51 }
 0x1db   :  { %v1379_v37 = vpop.f32.mrb[0].mxu0 }
 0x1dc   :  { %v2366_v38 = vadd.f32 %v1379_v37, %v289_v35  ;;  %v1381_v39 = vpop.f32.mrb[1].mxu0 }
 0x1dd   :  { %v2367_v40 = vadd.f32 %v1381_v39, %v293_v36  ;;  %v1383_v41 = vpop.f32.mrb[2].mxu0 }
 0x1de   :  { %v1546_v42 = vsub.f32 0.0, %v2366_v38  ;;  %v1384_v43 = vpop.f32.mrb[3].mxu0 }
 0x1df   :  { %v1547_v44 = vsub.f32 0.0, %v2367_v40 }
 0x1e0   :  { %v1549_v45 = vmul.f32 1.442695, %v1546_v42 }
 0x1e1   :  { %v1551_v46 = vmul.f32 1.442695, %v1547_v44 }
 0x1e2   :  { %2653 = vpow2.f32 %v1549_v45 }
 0x1e3   :  { %2655 = vpow2.f32 %v1551_v46 }
 0x1ec   :  { %v2654_v47 = vpop.eup %2653 }
 0x1ed   :  { %v2656_v48 = vpop.eup %2655  ;;  %v1555_v49 = vadd.f32 1.0, %v2654_v47 }
 0x1ee   :  { %v1556_v50 = vadd.f32 1.0, %v2656_v48 }
 0x1ef   :  { %2657 = vrcp.f32 %v1555_v49 }
 0x1f0   :  { %2659 = vrcp.f32 %v1556_v50 }
 0x1f1   :  { %2661 = vpow2.f32 %v1553_v55 }
 0x1f9   :  { %v2658_v53 = vpop.eup %2657 }
 0x1fa   :  { %v2660_v54 = vpop.eup %2659  ;;  %v1561_v58 = vpack.c.bf16 %v2658_v53, %v2658_v53 }
 0x1fb   :  { %v1562_v56 = vpack.c.bf16 %v2660_v54, %v2660_v54  ;;  %v2662_v62 = vpop.eup %2661 }
 0x1fc   :  { %v1557_v63 = vadd.f32 1.0, %v2662_v62 }
 0x1fd   :  { %1795 = vmatprep.mubr.bf16.mxu1 %v1562_v56 }
 0x1fe   :  { %1796 = vmatmul.mubr.bf16.vlgmr.msra.gmra.mrb[16].mxu1 %v1561_v58  ;;  %2663 = vrcp.f32 %v1557_v63 }
 0x1ff   :  { %2327 = vmatpush3.bf16.msra.mxu1 %v2637_v57  ;;  %2342 = vmatprep.mubr.msk.bf16.mxu1 %vm2752_vm0, %v2751_v52 }
 0x200   :  { %2328 = vmatprep.subr.bf16.mxu1 %v2751_v52 }
 0x203   :  { %2329 = vmatpush3.bf16.msra.mxu1 %v2638_v59 }
 0x204   :  { %2330 = vmatprep.subr.bf16.mxu1 %v2751_v52 }
 0x207   :  { %2331 = vmatpush3.bf16.msra.mxu1 %v2639_v60 }
 0x208   :  { %2332 = vmatprep.subr.bf16.mxu1 %v2751_v52  ;;  %v2664_v4 = vpop.eup %2663 }
 0x209   :  { %v1563_v5 = vpack.c.bf16 %v2664_v4, %v2664_v4 }
 0x20b   :  { %2333 = vmatpush3.bf16.msra.mxu1 %v2640_v61 }
 0x20c   :  { %2334 = vmatprep.subr.bf16.mxu1 %v2751_v52 }
 0x20f   :  { %2335 = vmatpush3.bf16.msra.mxu1 %v2641_v0 }
 0x210   :  { %2336 = vmatprep.subr.bf16.mxu1 %v2751_v52 }
 0x213   :  { %2337 = vmatpush3.bf16.msra.mxu1 %v2642_v1 }
 0x214   :  { %2338 = vmatprep.subr.bf16.mxu1 %v2751_v52 }
 0x217   :  { %2339 = vmatpush3.bf16.msra.mxu1 %v2643_v2 }
 0x218   :  { %2340 = vmatprep.subr.bf16.mxu1 %v2751_v52 }
 0x21b   :  { %2341 = vmatpush3.bf16.msra.mxu1 %v2644_v3 }
 0x21c   :  { %2346 = vmatprep.subr.bf16.mxu1 %v2751_v52 }
 0x21e   :  { %2343 = vmatmul.mubr.bf16.vlgmr.msra.gmra.mrb[20].mxu1 %v1563_v5 }
 0x21f   :  { %2362 = vmatprep.mubr.msk.bf16.mxu1 %vm2752_vm0, %v2751_v52  ;;  %2347 = vmatpush3.bf16.msra.mxu1 %v2645_v6 }
 0x220   :  { %2348 = vmatprep.subr.bf16.mxu1 %v2751_v52 }
 0x223   :  { %2349 = vmatpush3.bf16.msra.mxu1 %v2646_v7 }
 0x224   :  { %2350 = vmatprep.subr.bf16.mxu1 %v2751_v52 }
 0x227   :  { %2351 = vmatpush3.bf16.msra.mxu1 %v2647_v8 }
 0x228   :  { %2352 = vmatprep.subr.bf16.mxu1 %v2751_v52 }
 0x22b   :  { %2353 = vmatpush3.bf16.msra.mxu1 %v2648_v9 }
 0x22c   :  { %2354 = vmatprep.subr.bf16.mxu1 %v2751_v52 }
 0x22f   :  { %2355 = vmatpush3.bf16.msra.mxu1 %v2649_v10 }
 0x230   :  { %2356 = vmatprep.subr.bf16.mxu1 %v2751_v52 }
 0x233   :  { %2357 = vmatpush3.bf16.msra.mxu1 %v2650_v11 }
 0x234   :  { %2358 = vmatprep.subr.bf16.mxu1 %v2751_v52 }
 0x237   :  { %2359 = vmatpush3.bf16.msra.mxu1 %v2651_v12 }
 0x238   :  { %2360 = vmatprep.subr.bf16.mxu1 %v2751_v52 }
 0x23b   :  { %2361 = vmatpush3.bf16.msra.mxu1 %v2652_v13 }
 0x2d1   :  { %v2282_v14 = vpop.f32.mrb[16].mxu1 }
 0x2d2   :  { %v2283_v15 = vpop.f32.mrb[17].mxu1 }
 0x2d3   :  { %v2284_v16 = vadd.f32 %v2283_v15, %v2282_v14  ;;  %v2285_v17 = vpop.f32.mrb[18].mxu1 }
 0x2d4   :  { %v2286_v18 = vpop.f32.mrb[19].mxu1 }
 0x2d5   :  { %v1798_v20 = vadd.f32 %v2284_v16, %v2157_v19 }
 0x2f1   :  { %v1837_v21 = vpop.f32.mrb[20].mxu1 }
 0x2f2   :  { %v1838_v22 = vadd.f32 %v1837_v21, %v1798_v20  ;;  %v2344_v23 = vpop.f32.mrb[21].mxu1 }
 0x2f3   :  { %v1840_v24 = vpop.f32.mrb[22].mxu1 }
 0x2f4   :  { %v1843_v25 = vsub.f32 0.0, %v1838_v22  ;;  %v2345_v26 = vpop.f32.mrb[23].mxu1 }
 0x2f6   :  { %v1844_v27 = vmul.f32 1.442695, %v1843_v25 }
 0x2f8   :  { %2665 = vpow2.f32 %v1844_v27 }
 0x302   :  { %v2666_v52 = vpop.eup %2665 }
 0x303   :  { %v1846_v28 = vadd.f32 1.0, %v2666_v52 }
 0x305   :  { %2667 = vrcp.f32 %v1846_v28 }
 0x30f   :  { %v2668_v29 = vpop.eup %2667 }
 0x310   :  { %v1848_v30 = vpack.c.bf16 %v2668_v29, %v2668_v29 }
 0x312   :  { %2363 = vmatmul.mubr.bf16.vlgmr.msra.gmra.mrb[24].mxu1 %v1848_v30 }
 0x3e5   :  { %v1954_v32 = vpop.f32.mrb[24].mxu1 }
 0x3e6   :  { %v1955_v33 = vadd.f32 %v2182_v31, %v1954_v32  ;;  %v2364_v34 = vpop.f32.mrb[25].mxu1 }
 0x3e7   :  { %v1957_v35 = vpop.f32.mrb[26].mxu1 }
 0x3e8   :  { %v1960_v36 = vsub.f32 0.0, %v1955_v33  ;;  %v2365_v37 = vpop.f32.mrb[27].mxu1 }
 0x3ea   :  { %v1961_v38 = vmul.f32 1.442695, %v1960_v36 }
 0x3ec   :  { %2669 = vpow2.f32 %v1961_v38 }
 0x3f6   :  { %v2670_v39 = vpop.eup %2669 }
 0x3f7   :  { %v1963_v40 = vadd.f32 1.0, %v2670_v39 }
 0x3f9   :  { %2671 = vrcp.f32 %v1963_v40 }
 0x403   :  { %v2672_v41 = vpop.eup %2671 }
 0x404   :  { %1965 = vst [vmem:[#allocation7] sm:$0xff] %v2672_v41 }
 0x405   :  { %2728 = shalt.err (!%p2725_p6)
}
 0x406   :  { %s2729_s9 = scalar_lea.hbm %s2929_s7, 128 }
 0x407   :  { %p2730_p7 = scmp.ne.s32.totalorder %s2929_s7, %s2729_s9  ;;  %p2733_p8 = scmp.lt.u32.totalorder %s2729_s9, %s2929_s7 }
 0x409   :  { %p2735_p9 = pnand %p2733_p8, %p2730_p7 }
 0x40b   :  { %2738 = shalt.err (!%p2735_p9)
}
 0x40c   :  { %1975 = dma.vmem_to_hbm [thread:$0]  %s1973_s29, 128, %s2929_s7, [#allocation4]  }
 0x40d   :  { %2743 = dma.done.wait [#allocation4], 128  }
 0x40e   :  { %2744 = vsyncadd [#allocation4], 4294967168 }
 0x40f   :  { %1979 = vsyncpa [#allocation3], 1 }
 0x410   :  { %1980 = vsyncpa [#allocation6], 1 }
 0x411   :  { %1981 = vsyncpa [#allocation4], 1 }

</bundles_post_ra>
